<compile_context>
chip_gen: v5e
topology: v5e:2x2
jax: 0.10.0
libtpu: 0.0.40
codegen_flags: <defaults>
</compile_context>

<pallas_src>
import functools
import math

import jax
import jax.numpy as jnp
from jax import lax
from jax.experimental import pallas as pl
from jax.experimental.pallas import tpu as pltpu


def _round_up(x: int, m: int) -> int:
    return ((x + m - 1) // m) * m


def _apply_af(x, af: str):
    if af == "relu":
        return jnp.maximum(x, 0.0)
    if af == "tanh":
        return jnp.tanh(x)
    return x  # "linear"


def _single_layer_kernel(x_ref, w_ref, b_ref, o_ref, acc_ref, *, af, use_bf16):
    """One (i, j, k) grid step.

    x_ref:  (tm, tk)  activations tile (batch x in-features)
    w_ref:  (tn, tk)  weight tile in original PyTorch (out, in) layout
    b_ref:  (1,  tn)  bias tile (zeros if the layer has no bias)
    o_ref:  (tm, tn)  output tile
    acc_ref:(tm, tn)  f32 VMEM accumulator, resident across the k axis
    """
    k = pl.program_id(2)

    @pl.when(k == 0)
    def _init():
        # Fold the bias add into the accumulator init (free on the VPU slot).
        acc_ref[...] = jnp.broadcast_to(
            b_ref[...].astype(jnp.float32), acc_ref.shape)

    r = _apply_af(x_ref[...], af)
    w = w_ref[...]
    if use_bf16:
        # Reduced-precision MXU inputs (v6e/v7x); accumulation stays f32.
        r = r.astype(jnp.bfloat16)
        w = w.astype(jnp.bfloat16)

    # r @ W.T without materializing a transpose: contract in-features (dim 1)
    # of both operands. Result (tm, tn), accumulated in f32 on the MXU.
    acc_ref[...] += lax.dot_general(
        r, w,
        dimension_numbers=(((1,), (1,)), ((), ())),
        preferred_element_type=jnp.float32)

    @pl.when(k == pl.num_programs(2) - 1)
    def _store():
        o_ref[...] = acc_ref[...].astype(o_ref.dtype)


def single_layer_forward(x, weight, bias=None, *, af="relu", use_bf16=False,
                         tm=None, tn=None, tk=None):
    """Pallas equivalent of SingleLayer.forward.

    x:      [B, V]  float32
    weight: [V, V]  float32, PyTorch nn.Linear layout (out_features, in_features)
    bias:   [V] or None
    """
    if af not in ("relu", "tanh", "linear"):
        raise ValueError("No valid activation function.")
    B, V = x.shape
    assert weight.shape == (V, V)

    # ---- tile sizes (lane-dense, VMEM-budgeted for v7x's 64 MiB) ----
    v128 = _round_up(V, 128)
    if tn is None:
        tn = min(512, v128)
    if tk is None:
        tk = min(512, v128)
    if tm is None:
        tm = min(256, _round_up(B, 8))

    # Padded problem sizes: V serves as both K and N, so it must be a multiple
    # of both tk and tn; B a multiple of tm.
    Vp = _round_up(v128, math.lcm(tn, tk))
    Bp = _round_up(B, tm)

    # ---- zero-pad inputs (zero-padded W rows/cols => padded contributions
    #      are exactly 0; relu(0)=tanh(0)=0 so activation of padding is safe) --
    xp = x if (Bp, Vp) == (B, V) else jnp.pad(x, ((0, Bp - B), (0, Vp - V)))
    wp = weight if Vp == V else jnp.pad(weight, ((0, Vp - V), (0, Vp - V)))
    if bias is None:
        bp = jnp.zeros((1, Vp), dtype=x.dtype)
    else:
        bp = (bias if Vp == V else jnp.pad(bias, (0, Vp - V))).reshape(1, Vp)

    grid = (Bp // tm, Vp // tn, Vp // tk)
    kernel = functools.partial(_single_layer_kernel, af=af, use_bf16=use_bf16)

    cost = pl.CostEstimate(
        flops=2 * Bp * Vp * Vp,
        transcendentals=(Bp * Vp if af == "tanh" else 0),
        bytes_accessed=4 * (2 * Bp * Vp + Vp * Vp + Vp),
    )

    out = pl.pallas_call(
        kernel,
        out_shape=jax.ShapeDtypeStruct((Bp, Vp), x.dtype),
        grid_spec=pltpu.PrefetchScalarGridSpec(
            num_scalar_prefetch=0,
            grid=grid,
            in_specs=[
                pl.BlockSpec((tm, tk), lambda i, j, k: (i, k)),   # x
                pl.BlockSpec((tn, tk), lambda i, j, k: (j, k)),   # W (out, in)
                pl.BlockSpec((1, tn), lambda i, j, k: (0, j)),    # bias
            ],
            out_specs=pl.BlockSpec((tm, tn), lambda i, j, k: (i, j)),
            scratch_shapes=[pltpu.VMEM((tm, tn), jnp.float32)],
        ),
        compiler_params=pltpu.CompilerParams(
            dimension_semantics=("parallel", "parallel", "arbitrary")),
        cost_estimate=cost,
    )(xp, wp, bp)

    if (Bp, Vp) != (B, V):
        out = out[:B, :V]
    return out


def _reference(x, weight, bias, af):
    if af == "relu":
        r = jnp.maximum(x, 0.0)
    elif af == "tanh":
        r = jnp.tanh(x)
    else:
        r = x
    u = jnp.dot(r, weight.T, precision=lax.Precision.HIGHEST)
    if bias is not None:
        u = u + bias
    return u


if __name__ == "__main__":
    key = jax.random.PRNGKey(0)

    # ---- primary case: params = {'visible_size': 32, 'bias': True, 'af': 'relu'}
    visible_size, batch, af = 32, 8, "relu"
    kx, kw, kb, k2 = jax.random.split(key, 4)
    bound = 1.0 / jnp.sqrt(visible_size)
    x = jax.random.normal(kx, (batch, visible_size), dtype=jnp.float32)
    weight = jax.random.uniform(kw, (visible_size, visible_size),
                                dtype=jnp.float32, minval=-bound, maxval=bound)
    bias = jax.random.uniform(kb, (visible_size,), dtype=jnp.float32,
                              minval=-bound, maxval=bound)

    out = single_layer_forward(x, weight, bias, af=af)
    out = jax.block_until_ready(out)
    ref = _reference(x, weight, bias, af)
    assert out.shape == (batch, visible_size)
    assert jnp.allclose(out, ref, atol=1e-5, rtol=1e-5), "mismatch (relu, bias)"

    # ---- secondary case: exercises padding + multi-step (i, j, k) tiling
    V2, B2, af2 = 300, 24, "tanh"
    k2x, k2w = jax.random.split(k2)
    bound2 = 1.0 / jnp.sqrt(V2)
    x2 = jax.random.normal(k2x, (B2, V2), dtype=jnp.float32)
    w2 = jax.random.uniform(k2w, (V2, V2), dtype=jnp.float32,
                            minval=-bound2, maxval=bound2)
    out2 = single_layer_forward(x2, w2, None, af=af2, tm=8, tn=128, tk=128)
    out2 = jax.block_until_ready(out2)
    ref2 = _reference(x2, w2, None, af2)
    assert out2.shape == (B2, V2)
    assert jnp.allclose(out2, ref2, atol=1e-4, rtol=1e-4), "mismatch (tanh, tiled)"

    print("KERNEL_OK")
</pallas_src>

<mosaic_0001>
module attributes {stable_mosaic.version = 11 : i64} {
  func.func @_single_layer_kernel(%arg0: i32, %arg1: i32, %arg2: i32, %arg3: memref<8x128xf32, #tpu.memory_space<vmem>>, %arg4: memref<128x128xf32, #tpu.memory_space<vmem>>, %arg5: memref<1x128xf32, #tpu.memory_space<vmem>>, %arg6: memref<8x128xf32, #tpu.memory_space<vmem>>, %arg7: memref<8x128xf32, #tpu.memory_space<vmem>>) attributes {dimension_semantics = [#tpu.dimension_semantics<parallel>, #tpu.dimension_semantics<parallel>, #tpu.dimension_semantics<arbitrary>], iteration_bounds = array<i64: 1, 1, 1>, scalar_prefetch = 0 : i64, scratch_operands = 1 : i64, tpu.core_type = #tpu.core_type<tc>, window_params = [{transform_indices = @transform_0, window_bounds = array<i64: 8, 128>}, {transform_indices = @transform_1, window_bounds = array<i64: 128, 128>}, {transform_indices = @transform_2, window_bounds = array<i64: 1, 128>}, {transform_indices = @transform_3, window_bounds = array<i64: 8, 128>}]} {
    %c0_i32 = arith.constant 0 : i32
    %0 = arith.cmpi eq, %arg2, %c0_i32 : i32
    %1 = arith.extui %0 : i1 to i32
    %c0_i32_0 = arith.constant 0 : i32
    %2 = arith.cmpi ne, %1, %c0_i32_0 : i32
    scf.if %2 {
      %c0_11 = arith.constant 0 : index
      %c0_12 = arith.constant 0 : index
      %14 = vector.load %arg5[%c0_11, %c0_12] : memref<1x128xf32, #tpu.memory_space<vmem>>, vector<1x128xf32>
      %15 = vector.shape_cast %14 : vector<1x128xf32> to vector<1x128xf32>
      %16 = vector.broadcast %15 : vector<1x128xf32> to vector<8x128xf32>
      %c0_13 = arith.constant 0 : index
      %c0_14 = arith.constant 0 : index
      %17 = vector.load %arg7[%c0_13, %c0_14] : memref<8x128xf32, #tpu.memory_space<vmem>>, vector<8x128xf32>
      tpu.vector_store %arg7[%c0_13, %c0_14], %16 {strides = array<i32>} : memref<8x128xf32, #tpu.memory_space<vmem>>, vector<8x128xf32>,
    } else {
    }
    %c0 = arith.constant 0 : index
    %c0_1 = arith.constant 0 : index
    %3 = vector.load %arg3[%c0, %c0_1] : memref<8x128xf32, #tpu.memory_space<vmem>>, vector<8x128xf32>
    %cst = arith.constant 0.000000e+00 : f32
    %4 = vector.broadcast %cst : f32 to vector<8x128xf32>
    %5 = arith.maximumf %3, %4 : vector<8x128xf32>
    %c0_2 = arith.constant 0 : index
    %c0_3 = arith.constant 0 : index
    %6 = vector.load %arg4[%c0_2, %c0_3] : memref<128x128xf32, #tpu.memory_space<vmem>>, vector<128x128xf32>
    %c0_4 = arith.constant 0 : index
    %c0_5 = arith.constant 0 : index
    %7 = vector.load %arg7[%c0_4, %c0_5] : memref<8x128xf32, #tpu.memory_space<vmem>>, vector<8x128xf32>
    %cst_6 = arith.constant dense<0.000000e+00> : vector<8x128xf32>
    %8 = tpu.matmul %5, %6, %cst_6 {dimension_numbers = #tpu.dot_dimension_numbers<[1], [1], [0], [0], [0, 0, 1, 0], [], []>} : vector<8x128xf32>, vector<128x128xf32>, vector<8x128xf32> -> vector<8x128xf32>
    %9 = arith.addf %7, %8 : vector<8x128xf32>
    %c0_7 = arith.constant 0 : index
    %c0_8 = arith.constant 0 : index
    %10 = vector.load %arg7[%c0_7, %c0_8] : memref<8x128xf32, #tpu.memory_space<vmem>>, vector<8x128xf32>
    tpu.vector_store %arg7[%c0_7, %c0_8], %9 {strides = array<i32>} : memref<8x128xf32, #tpu.memory_space<vmem>>, vector<8x128xf32>,
    %c0_i32_9 = arith.constant 0 : i32
    %11 = arith.cmpi eq, %arg2, %c0_i32_9 : i32
    %12 = arith.extui %11 : i1 to i32
    %c0_i32_10 = arith.constant 0 : i32
    %13 = arith.cmpi ne, %12, %c0_i32_10 : i32
    scf.if %13 {
      %c0_11 = arith.constant 0 : index
      %c0_12 = arith.constant 0 : index
      %14 = vector.load %arg7[%c0_11, %c0_12] : memref<8x128xf32, #tpu.memory_space<vmem>>, vector<8x128xf32>
      %c0_13 = arith.constant 0 : index
      %c0_14 = arith.constant 0 : index
      %15 = vector.load %arg6[%c0_13, %c0_14] : memref<8x128xf32, #tpu.memory_space<vmem>>, vector<8x128xf32>
      tpu.vector_store %arg6[%c0_13, %c0_14], %14 {strides = array<i32>} : memref<8x128xf32, #tpu.memory_space<vmem>>, vector<8x128xf32>,
    } else {
    }
    return
  }
  func.func @transform_0(%arg0: i32, %arg1: i32, %arg2: i32) -> (i32, i32) {
    %c0_i32 = arith.constant 0 : i32
    return %arg0, %arg2 : i32, i32
  }
  func.func @transform_1(%arg0: i32, %arg1: i32, %arg2: i32) -> (i32, i32) {
    %c0_i32 = arith.constant 0 : i32
    return %arg1, %arg2 : i32, i32
  }
  func.func @transform_2(%arg0: i32, %arg1: i32, %arg2: i32) -> (i32, i32) {
    %c0_i32 = arith.constant 0 : i32
    %c0_i32_0 = arith.constant 0 : i32
    return %c0_i32, %arg1 : i32, i32
  }
  func.func @transform_3(%arg0: i32, %arg1: i32, %arg2: i32) -> (i32, i32) {
    %c0_i32 = arith.constant 0 : i32
    return %arg0, %arg1 : i32, i32
  }
}

</mosaic_0001>

<bundles_post_ra>
// kernel: tpu_custom_call.1
= control target key start
LH: loop header
LB: loop body
LE: loop exit
PB: predicated region body
PF: predicated region fallthrough
CT: control target
= control target key end

     0   :  { %8 = vsyncpa [#allocation4], 0  ;;  %s239_s0 = inlined_call_operand.hbm [shape: f32[8,128], index: 0, kind: input, shape index: {}]   ;;  %s240_s1 = inlined_call_operand.hbm [shape: f32[128,128], index: 1, kind: input, shape index: {}]   ;;  %s241_s2 = inlined_call_operand.vmem [shape: f32[1,128], index: 2, kind: input, shape index: {}]   ;;  %s242_s3 = inlined_call_operand.hbm [shape: f32[8,128], index: 3, kind: output, shape index: {}]  }
   0x1   :  { %9 = vsyncpa [#allocation7], 0 }
   0x2   :  { %10 = vsyncpa [#allocation5], 0  ;;  %s16_s14 = sshll.u32 %s239_s0, 4  ;;  %s202_s15 = smov [#allocation3]   ;;  %s17_s14 = int_to_ptr.hbm [resolvable:$true] %s16_s14 }
   0x3   :  { %s18_s16 = sshll.u32 %s202_s15, 4  ;;  %s26_s19 = sshll.u32 %s240_s1, 4  ;;  %s19_s16 = int_to_ptr.vmem [resolvable:$true] %s18_s16  ;;  %s27_s19 = int_to_ptr.hbm [resolvable:$true] %s26_s19 }
   0x4   :  { %21 = dma.hbm_to_vmem [thread:$0]  %s17_s14, 128, %s19_s16, [#allocation4]  }
   0x5   :  { %s203_s20 = smov [#allocation6]   ;;  %s204_s22 = smov 128  }
   0x6   :  { %s28_s21 = sshll.u32 %s203_s20, 4  ;;  %s205_s23 = smov 8   ;;  %s29_s21 = int_to_ptr.vmem [resolvable:$true] %s28_s21 }
   0x7   :  { %34 = dma.hbm_to_vmem [thread:$0]  %s27_s19, 2048, %s29_s21, [#allocation7], %s204_s22, %s204_s22, %s205_s23  }
   0x8   :  { %196 = dma.done.wait [#allocation4], 128  }
   0x9   :  { %197 = vsyncadd [#allocation4], 4294967168 }
   0xa   :  { %198 = dma.done.wait [#allocation7], 2048  }
   0xb   :  { %199 = vsyncadd [#allocation7], 4294965248  ;;  %v71_v0 = vld [vmem:[#allocation6 + $0x78] sm:$0xff]  ;;  %v70_v1 = vld [vmem:[#allocation6 + $0x70] sm:$0xff]  ;;  %s206_s24 = smov [#allocation8]   ;;  %s107_s28 = sshll.u32 %s242_s3, 4  ;;  %s108_s28 = int_to_ptr.hbm [resolvable:$true] %s107_s28 }
   0xc   :  { %73 = vmatpush.xpose.msra.mxu0 %v71_v0  ;;  %v69_v2 = vld [vmem:[#allocation6 + $0x68] sm:$0xff]  ;;  %v68_v3 = vld [vmem:[#allocation6 + $0x60] sm:$0xff]  ;;  %v67_v4 = vld [vmem:[#allocation6 + $0x58] sm:$0xff]  ;;  %s105_s25 = sshll.u32 %s206_s24, 4  ;;  %s106_s25 = int_to_ptr.vmem [resolvable:$true] %s105_s25 }
   0xd   :  { %v66_v5 = vld [vmem:[#allocation6 + $0x50] sm:$0xff]  ;;  %v65_v6 = vld [vmem:[#allocation6 + $0x48] sm:$0xff]  ;;  %v64_v7 = vld [vmem:[#allocation6 + $0x40] sm:$0xff] }
   0xe   :  { %v63_v8 = vld [vmem:[#allocation6 + $0x38] sm:$0xff]  ;;  %v62_v9 = vld [vmem:[#allocation6 + $0x30] sm:$0xff]  ;;  %v61_v10 = vld [vmem:[#allocation6 + $0x28] sm:$0xff] }
   0xf   :  { %v60_v11 = vld [vmem:[#allocation6 + $0x20] sm:$0xff]  ;;  %v59_v12 = vld [vmem:[#allocation6 + $0x18] sm:$0xff]  ;;  %v58_v13 = vld [vmem:[#allocation6 + $0x10] sm:$0xff] }
  0x10   :  { %74 = vmatpush.xpose.msra.mxu0 %v70_v1  ;;  %v57_v14 = vld [vmem:[#allocation6 + $0x8] sm:$0xff]  ;;  %v54_v15 = vld [vmem:[#allocation3] sm:$0xff]  ;;  %v56_v16 = vld [vmem:[#allocation6] sm:$0xff] }
  0x11   :  { %v55_v17 = vmax.f32 %v54_v15, 0.0  ;;  %v123_v18 = vld [vmem:[%s241_s2] ss:$0 sm:$0xff] }
  0x14   :  { %75 = vmatpush.xpose.msra.mxu0 %v69_v2 }
  0x18   :  { %76 = vmatpush.xpose.msra.mxu0 %v68_v3 }
  0x1c   :  { %77 = vmatpush.xpose.msra.mxu0 %v67_v4 }
  0x20   :  { %78 = vmatpush.xpose.msra.mxu0 %v66_v5 }
  0x24   :  { %79 = vmatpush.xpose.msra.mxu0 %v65_v6 }
  0x28   :  { %80 = vmatpush.xpose.msra.mxu0 %v64_v7 }
  0x2c   :  { %81 = vmatpush.xpose.msra.mxu0 %v63_v8 }
  0x30   :  { %82 = vmatpush.xpose.msra.mxu0 %v62_v9 }
  0x34   :  { %83 = vmatpush.xpose.msra.mxu0 %v61_v10 }
  0x38   :  { %84 = vmatpush.xpose.msra.mxu0 %v60_v11 }
  0x3c   :  { %85 = vmatpush.xpose.msra.mxu0 %v59_v12 }
  0x40   :  { %86 = vmatpush.xpose.msra.mxu0 %v58_v13 }
  0x44   :  { %87 = vmatpush.xpose.msra.mxu0 %v57_v14 }
  0x48   :  { %88 = vmatpush.xpose.msra.mxu0 %v56_v16 }
  0x4b   :  { %89 = vmatmul.f32.vlgmr.msra.gmra.mxu0 %v55_v17 }
  0xc8   :  { %v90_v19 = vpop.f32.mrf.mxu0 }
  0xc9   :  { %v93_v20 = vadd.f32 %v123_v18, %v90_v19 }
  0xcb   :  { %99 = vst [vmem:[#allocation8] sm:$0xff] %v93_v20 }
  0xcc   :  { %110 = dma.vmem_to_hbm [thread:$0]  %s106_s25, 128, %s108_s28, [#allocation5]  }
  0xcd   :  { %200 = dma.done.wait [#allocation5], 128  }
  0xce   :  { %201 = vsyncadd [#allocation5], 4294967168 }
  0xcf   :  { %115 = vsyncpa [#allocation4], 1 }
  0xd0   :  { %116 = vsyncpa [#allocation7], 1 }
  0xd1   :  { %117 = vsyncpa [#allocation5], 1 }

</bundles_post_ra>
